<compile_context>
chip_gen: v6e
topology: v6e:2x2x1
jax: 0.10.0
libtpu: 0.0.40
codegen_flags: <defaults>
</compile_context>

<pallas_src>
import jax
import jax.numpy as jnp
from jax.experimental import pallas as pl
from jax.experimental.pallas import tpu as pltpu

_NEG_BIG = -1e30  # bias value for padded logit lanes -> exp() underflows to 0


def _round_up(n, m):
    return ((n + m - 1) // m) * m


# -----------------------------------------------------------------------------
# Kernel: one grid step == one RNN time step.  Hidden state lives in VMEM
# scratch across the (sequential) time grid; weights are VMEM-resident.
# -----------------------------------------------------------------------------
def rnn_seq_kernel(x_ref, h0_ref, wx_ref, wh_ref, bih_ref, who_ref, bho_ref,
                   out_ref, hlast_ref, h_scr):
    t = pl.program_id(0)

    @pl.when(t == 0)
    def _init():
        h_scr[...] = h0_ref[...]

    cd = wx_ref.dtype                     # compute (MXU operand) dtype
    x = x_ref[0]                          # (BP, XP)
    h_prev = h_scr[...].astype(cd)        # (BP, HP)

    # i2h: Linear(xdim+hdim -> hdim) on concat(x, h), split into two MXU dots.
    pre_h = (jnp.dot(x, wx_ref[...], preferred_element_type=jnp.float32)
             + jnp.dot(h_prev, wh_ref[...], preferred_element_type=jnp.float32)
             + bih_ref[...])                                   # (BP, HP) f32
    h_new = jnp.tanh(pre_h)                                    # f32 EUP math
    h_scr[...] = h_new
    hlast_ref[...] = h_new.astype(hlast_ref.dtype)

    # h2o: Linear(hdim -> ydim).  Padded output lanes carry a -1e30 bias.
    logits = (jnp.dot(h_new.astype(cd), who_ref[...],
                      preferred_element_type=jnp.float32)
              + bho_ref[...])                                  # (BP, YP)

    # LogSoftmax over the lane (class) axis, numerically stable.
    m = jnp.max(logits, axis=1, keepdims=True)
    shifted = logits - m
    lse = jnp.log(jnp.sum(jnp.exp(shifted), axis=1, keepdims=True))
    out_ref[0] = (shifted - lse).astype(out_ref.dtype)


# -----------------------------------------------------------------------------
# One-time parameter packing (hoisted out of the per-step / per-call path).
# -----------------------------------------------------------------------------
def pack_params(params, xdim, hdim, ydim, compute_dtype=jnp.float32):
    """Pre-transpose, split and zero-pad the torch-layout weights to 128-lane
    tiles.  Set compute_dtype=jnp.bfloat16 on v6e/v7x for native MXU rate and
    half the weight DMA bytes (biases / accumulation stay f32)."""
    XP, HP, YP = _round_up(xdim, 128), _round_up(hdim, 128), _round_up(ydim, 128)

    w_i2h_t = params["i2h_w"].T                      # (xdim+hdim, hdim)
    wx = w_i2h_t[:xdim, :]                           # (xdim, hdim)
    wh = w_i2h_t[xdim:, :]                           # (hdim, hdim)
    who = params["h2o_w"].T                          # (hdim, ydim)

    wx_p = jnp.zeros((XP, HP), compute_dtype).at[:xdim, :hdim].set(
        wx.astype(compute_dtype))
    wh_p = jnp.zeros((HP, HP), compute_dtype).at[:hdim, :hdim].set(
        wh.astype(compute_dtype))
    who_p = jnp.zeros((HP, YP), compute_dtype).at[:hdim, :ydim].set(
        who.astype(compute_dtype))
    bih_p = jnp.zeros((1, HP), jnp.float32).at[0, :hdim].set(params["i2h_b"])
    # Padded logit lanes get -1e30 so they contribute nothing to the softmax.
    bho_p = jnp.full((1, YP), _NEG_BIG, jnp.float32).at[0, :ydim].set(
        params["h2o_b"])

    return {"wx": wx_p, "wh": wh_p, "bih": bih_p, "who": who_p, "bho": bho_p,
            "dims": (xdim, hdim, ydim), "pads": (XP, HP, YP)}


# -----------------------------------------------------------------------------
# Whole-sequence forward: xs (T, B, xdim), hidden0 (B, hdim)
#   -> (outputs (T, B, ydim), hidden_T (B, hdim))
# -----------------------------------------------------------------------------
def rnn_forward_sequence(xs, hidden0, packed):
    T, B, xdim = xs.shape
    _, hdim, ydim = packed["dims"]
    XP, HP, YP = packed["pads"]
    BP = _round_up(max(B, 8), 8)          # fill f32 sublanes / MXU rows
    cd = packed["wx"].dtype

    xs_p = jnp.zeros((T, BP, XP), cd).at[:, :B, :xdim].set(xs.astype(cd))
    h0_p = jnp.zeros((BP, HP), jnp.float32).at[:B, :hdim].set(hidden0)

    const2 = lambda t: (0, 0)
    out_p, hlast_p = pl.pallas_call(
        rnn_seq_kernel,
        out_shape=(jax.ShapeDtypeStruct((T, BP, YP), jnp.float32),
                   jax.ShapeDtypeStruct((BP, HP), jnp.float32)),
        grid=(T,),
        in_specs=[
            pl.BlockSpec((1, BP, XP), lambda t: (t, 0, 0)),   # x_t
            pl.BlockSpec((BP, HP), const2),                   # h0 (resident)
            pl.BlockSpec((XP, HP), const2),                   # Wx (resident)
            pl.BlockSpec((HP, HP), const2),                   # Wh (resident)
            pl.BlockSpec((1, HP), const2),                    # b_i2h
            pl.BlockSpec((HP, YP), const2),                   # Who (resident)
            pl.BlockSpec((1, YP), const2),                    # b_h2o
        ],
        out_specs=(
            pl.BlockSpec((1, BP, YP), lambda t: (t, 0, 0)),   # log-probs
            pl.BlockSpec((BP, HP), const2),                   # final hidden
        ),
        scratch_shapes=[pltpu.VMEM((BP, HP), jnp.float32)],   # hidden carry
        compiler_params=pltpu.CompilerParams(
            dimension_semantics=("arbitrary",)),              # time is serial
    )(xs_p, h0_p, packed["wx"], packed["wh"], packed["bih"],
      packed["who"], packed["bho"])

    return out_p[:, :B, :ydim], hlast_p[:B, :hdim]
    # TODO(synk): for large B on v7x, add a leading "parallel" grid axis over
    # batch shards so both TensorCores are used.


def rnn_forward_step(x, hidden, packed):
    """Single-step API matching the PyTorch module's forward(x, hidden)."""
    out, h = rnn_forward_sequence(x[None], hidden, packed)
    return out[0], h


# -----------------------------------------------------------------------------
# Deterministic init mimicking torch.nn.Linear (uniform +/- 1/sqrt(fan_in)).
# -----------------------------------------------------------------------------
def init_params(key, xdim, hdim, ydim):
    k1, k2, k3, k4 = jax.random.split(key, 4)
    b1 = 1.0 / jnp.sqrt(xdim + hdim)
    b2 = 1.0 / jnp.sqrt(hdim)
    return {
        "i2h_w": jax.random.uniform(k1, (hdim, xdim + hdim), jnp.float32, -b1, b1),
        "i2h_b": jax.random.uniform(k2, (hdim,), jnp.float32, -b1, b1),
        "h2o_w": jax.random.uniform(k3, (ydim, hdim), jnp.float32, -b2, b2),
        "h2o_b": jax.random.uniform(k4, (ydim,), jnp.float32, -b2, b2),
    }


def reference_sequence(xs, hidden, params):
    """Pure-JAX reference: the PyTorch math applied step by step."""
    outs, h = [], hidden
    for t in range(xs.shape[0]):
        combined = jnp.concatenate([xs[t], h], axis=1)
        h = jnp.tanh(combined @ params["i2h_w"].T + params["i2h_b"])
        logits = h @ params["h2o_w"].T + params["h2o_b"]
        outs.append(jax.nn.log_softmax(logits, axis=1))
    return jnp.stack(outs), h


if __name__ == "__main__":
    key = jax.random.PRNGKey(0)
    xdim, hdim, ydim = 16, 32, 16
    batch, seq_len = 2, 8

    kp, kx = jax.random.split(key)
    params = init_params(kp, xdim, hdim, ydim)
    packed = pack_params(params, xdim, hdim, ydim)     # done once, hoisted

    xs = jax.random.uniform(kx, (seq_len, batch, xdim), jnp.float32)
    hidden0 = jnp.zeros((batch, hdim), jnp.float32)    # getInitialHiddenState

    outputs, hidden_T = rnn_forward_sequence(xs, hidden0, packed)
    jax.block_until_ready((outputs, hidden_T))

    # Correctness vs pure-JAX reference (whole sequence).
    ref_outs, ref_h = reference_sequence(xs, hidden0, params)
    assert outputs.shape == (seq_len, batch, ydim)
    assert hidden_T.shape == (batch, hdim)
    assert jnp.allclose(outputs, ref_outs, atol=1e-4, rtol=1e-4), "output mismatch"
    assert jnp.allclose(hidden_T, ref_h, atol=1e-4, rtol=1e-4), "hidden mismatch"

    # Single-step API parity with the module's forward(x, hidden).
    out1, h1 = rnn_forward_step(xs[0], hidden0, packed)
    jax.block_until_ready((out1, h1))
    assert jnp.allclose(out1, ref_outs[0], atol=1e-4, rtol=1e-4), "step output mismatch"

    print("KERNEL_OK")
</pallas_src>

<mosaic_0001>
module attributes {stable_mosaic.version = 11 : i64} {
  func.func @rnn_seq_kernel(%arg0: i32, %arg1: memref<1x8x128xf32, #tpu.memory_space<vmem>>, %arg2: memref<8x128xf32, #tpu.memory_space<vmem>>, %arg3: memref<128x128xf32, #tpu.memory_space<vmem>>, %arg4: memref<128x128xf32, #tpu.memory_space<vmem>>, %arg5: memref<1x128xf32, #tpu.memory_space<vmem>>, %arg6: memref<128x128xf32, #tpu.memory_space<vmem>>, %arg7: memref<1x128xf32, #tpu.memory_space<vmem>>, %arg8: memref<1x8x128xf32, #tpu.memory_space<vmem>>, %arg9: memref<8x128xf32, #tpu.memory_space<vmem>>, %arg10: memref<8x128xf32, #tpu.memory_space<vmem>>) attributes {dimension_semantics = [#tpu.dimension_semantics<arbitrary>], iteration_bounds = array<i64: 8>, scalar_prefetch = 0 : i64, scratch_operands = 1 : i64, tpu.core_type = #tpu.core_type<tc>, window_params = [{transform_indices = @transform_0, window_bounds = array<i64: 1, 8, 128>}, {pipeline_mode = #tpu.pipeline_mode<synchronous>, transform_indices = @transform_1, window_bounds = array<i64: 8, 128>}, {pipeline_mode = #tpu.pipeline_mode<synchronous>, transform_indices = @transform_2, window_bounds = array<i64: 128, 128>}, {pipeline_mode = #tpu.pipeline_mode<synchronous>, transform_indices = @transform_3, window_bounds = array<i64: 128, 128>}, {pipeline_mode = #tpu.pipeline_mode<synchronous>, transform_indices = @transform_4, window_bounds = array<i64: 1, 128>}, {pipeline_mode = #tpu.pipeline_mode<synchronous>, transform_indices = @transform_5, window_bounds = array<i64: 128, 128>}, {pipeline_mode = #tpu.pipeline_mode<synchronous>, transform_indices = @transform_6, window_bounds = array<i64: 1, 128>}, {transform_indices = @transform_7, window_bounds = array<i64: 1, 8, 128>}, {pipeline_mode = #tpu.pipeline_mode<synchronous>, transform_indices = @transform_8, window_bounds = array<i64: 8, 128>}]} {
    %c0_i32 = arith.constant 0 : i32
    %0 = arith.cmpi eq, %arg0, %c0_i32 : i32
    %1 = arith.extui %0 : i1 to i32
    %c0_i32_0 = arith.constant 0 : i32
    %2 = arith.cmpi ne, %1, %c0_i32_0 : i32
    scf.if %2 {
      %c0_26 = arith.constant 0 : index
      %c0_27 = arith.constant 0 : index
      %35 = vector.load %arg2[%c0_26, %c0_27] : memref<8x128xf32, #tpu.memory_space<vmem>>, vector<8x128xf32>
      %c0_28 = arith.constant 0 : index
      %c0_29 = arith.constant 0 : index
      %36 = vector.load %arg10[%c0_28, %c0_29] : memref<8x128xf32, #tpu.memory_space<vmem>>, vector<8x128xf32>
      tpu.vector_store %arg10[%c0_28, %c0_29], %35 {strides = array<i32>} : memref<8x128xf32, #tpu.memory_space<vmem>>, vector<8x128xf32>,
    } else {
    }
    %c0 = arith.constant 0 : index
    %c0_1 = arith.constant 0 : index
    %c0_2 = arith.constant 0 : index
    %3 = vector.load %arg1[%c0, %c0_1, %c0_2] : memref<1x8x128xf32, #tpu.memory_space<vmem>>, vector<1x8x128xf32>
    %4 = vector.shape_cast %3 : vector<1x8x128xf32> to vector<8x128xf32>
    %c0_3 = arith.constant 0 : index
    %c0_4 = arith.constant 0 : index
    %5 = vector.load %arg10[%c0_3, %c0_4] : memref<8x128xf32, #tpu.memory_space<vmem>>, vector<8x128xf32>
    %c0_5 = arith.constant 0 : index
    %c0_6 = arith.constant 0 : index
    %6 = vector.load %arg3[%c0_5, %c0_6] : memref<128x128xf32, #tpu.memory_space<vmem>>, vector<128x128xf32>
    %cst = arith.constant dense<0.000000e+00> : vector<8x128xf32>
    %7 = tpu.matmul %4, %6, %cst {dimension_numbers = #tpu.dot_dimension_numbers<[1], [0], [0], [1], [0, 0, 1, 1], [], []>} : vector<8x128xf32>, vector<128x128xf32>, vector<8x128xf32> -> vector<8x128xf32>
    %c0_7 = arith.constant 0 : index
    %c0_8 = arith.constant 0 : index
    %8 = vector.load %arg4[%c0_7, %c0_8] : memref<128x128xf32, #tpu.memory_space<vmem>>, vector<128x128xf32>
    %cst_9 = arith.constant dense<0.000000e+00> : vector<8x128xf32>
    %9 = tpu.matmul %5, %8, %cst_9 {dimension_numbers = #tpu.dot_dimension_numbers<[1], [0], [0], [1], [0, 0, 1, 1], [], []>} : vector<8x128xf32>, vector<128x128xf32>, vector<8x128xf32> -> vector<8x128xf32>
    %10 = arith.addf %7, %9 : vector<8x128xf32>
    %c0_10 = arith.constant 0 : index
    %c0_11 = arith.constant 0 : index
    %11 = vector.load %arg5[%c0_10, %c0_11] : memref<1x128xf32, #tpu.memory_space<vmem>>, vector<1x128xf32>
    %12 = vector.broadcast %11 : vector<1x128xf32> to vector<8x128xf32>
    %13 = arith.addf %10, %12 : vector<8x128xf32>
    %14 = math.tanh %13 : vector<8x128xf32>
    %c0_12 = arith.constant 0 : index
    %c0_13 = arith.constant 0 : index
    %15 = vector.load %arg10[%c0_12, %c0_13] : memref<8x128xf32, #tpu.memory_space<vmem>>, vector<8x128xf32>
    tpu.vector_store %arg10[%c0_12, %c0_13], %14 {strides = array<i32>} : memref<8x128xf32, #tpu.memory_space<vmem>>, vector<8x128xf32>,
    %c0_14 = arith.constant 0 : index
    %c0_15 = arith.constant 0 : index
    %16 = vector.load %arg9[%c0_14, %c0_15] : memref<8x128xf32, #tpu.memory_space<vmem>>, vector<8x128xf32>
    tpu.vector_store %arg9[%c0_14, %c0_15], %14 {strides = array<i32>} : memref<8x128xf32, #tpu.memory_space<vmem>>, vector<8x128xf32>,
    %c0_16 = arith.constant 0 : index
    %c0_17 = arith.constant 0 : index
    %17 = vector.load %arg6[%c0_16, %c0_17] : memref<128x128xf32, #tpu.memory_space<vmem>>, vector<128x128xf32>
    %cst_18 = arith.constant dense<0.000000e+00> : vector<8x128xf32>
    %18 = tpu.matmul %14, %17, %cst_18 {dimension_numbers = #tpu.dot_dimension_numbers<[1], [0], [0], [1], [0, 0, 1, 1], [], []>} : vector<8x128xf32>, vector<128x128xf32>, vector<8x128xf32> -> vector<8x128xf32>
    %c0_19 = arith.constant 0 : index
    %c0_20 = arith.constant 0 : index
    %19 = vector.load %arg7[%c0_19, %c0_20] : memref<1x128xf32, #tpu.memory_space<vmem>>, vector<1x128xf32>
    %20 = vector.broadcast %19 : vector<1x128xf32> to vector<8x128xf32>
    %21 = arith.addf %18, %20 : vector<8x128xf32>
    %cst_21 = arith.constant dense<0xFF800000> : vector<8xf32>
    %22 = vector.multi_reduction <maximumf>, %21, %cst_21 [1] : vector<8x128xf32> to vector<8xf32>
    %23 = vector.shape_cast %22 : vector<8xf32> to vector<8x1xf32>
    %24 = vector.broadcast %23 : vector<8x1xf32> to vector<8x128xf32>
    %25 = arith.subf %21, %24 : vector<8x128xf32>
    %26 = math.exp %25 : vector<8x128xf32>
    %cst_22 = arith.constant dense<0.000000e+00> : vector<8xf32>
    %27 = vector.multi_reduction <add>, %26, %cst_22 [1] : vector<8x128xf32> to vector<8xf32>
    %28 = vector.shape_cast %27 : vector<8xf32> to vector<8x1xf32>
    %29 = math.log %28 : vector<8x1xf32>
    %30 = vector.broadcast %29 : vector<8x1xf32> to vector<8x128xf32>
    %31 = arith.subf %25, %30 : vector<8x128xf32>
    %c0_23 = arith.constant 0 : index
    %c0_24 = arith.constant 0 : index
    %c0_25 = arith.constant 0 : index
    %32 = vector.load %arg8[%c0_23, %c0_24, %c0_25] : memref<1x8x128xf32, #tpu.memory_space<vmem>>, vector<1x8x128xf32>
    %33 = vector.shape_cast %32 : vector<1x8x128xf32> to vector<8x128xf32>
    %34 = vector.shape_cast %31 : vector<8x128xf32> to vector<1x8x128xf32>
    tpu.vector_store %arg8[%c0_23, %c0_24, %c0_25], %34 {strides = array<i32>} : memref<1x8x128xf32, #tpu.memory_space<vmem>>, vector<1x8x128xf32>,
    return
  }
  func.func @transform_0(%arg0: i32) -> (i32, i32, i32) {
    %c0_i32 = arith.constant 0 : i32
    %c0_i32_0 = arith.constant 0 : i32
    %c0_i32_1 = arith.constant 0 : i32
    return %arg0, %c0_i32, %c0_i32_0 : i32, i32, i32
  }
  func.func @transform_1(%arg0: i32) -> (i32, i32) {
    %c0_i32 = arith.constant 0 : i32
    %c0_i32_0 = arith.constant 0 : i32
    %c0_i32_1 = arith.constant 0 : i32
    return %c0_i32, %c0_i32_0 : i32, i32
  }
  func.func @transform_2(%arg0: i32) -> (i32, i32) {
    %c0_i32 = arith.constant 0 : i32
    %c0_i32_0 = arith.constant 0 : i32
    %c0_i32_1 = arith.constant 0 : i32
    return %c0_i32, %c0_i32_0 : i32, i32
  }
  func.func @transform_3(%arg0: i32) -> (i32, i32) {
    %c0_i32 = arith.constant 0 : i32
    %c0_i32_0 = arith.constant 0 : i32
    %c0_i32_1 = arith.constant 0 : i32
    return %c0_i32, %c0_i32_0 : i32, i32
  }
  func.func @transform_4(%arg0: i32) -> (i32, i32) {
    %c0_i32 = arith.constant 0 : i32
    %c0_i32_0 = arith.constant 0 : i32
    %c0_i32_1 = arith.constant 0 : i32
    return %c0_i32, %c0_i32_0 : i32, i32
  }
  func.func @transform_5(%arg0: i32) -> (i32, i32) {
    %c0_i32 = arith.constant 0 : i32
    %c0_i32_0 = arith.constant 0 : i32
    %c0_i32_1 = arith.constant 0 : i32
    return %c0_i32, %c0_i32_0 : i32, i32
  }
  func.func @transform_6(%arg0: i32) -> (i32, i32) {
    %c0_i32 = arith.constant 0 : i32
    %c0_i32_0 = arith.constant 0 : i32
    %c0_i32_1 = arith.constant 0 : i32
    return %c0_i32, %c0_i32_0 : i32, i32
  }
  func.func @transform_7(%arg0: i32) -> (i32, i32, i32) {
    %c0_i32 = arith.constant 0 : i32
    %c0_i32_0 = arith.constant 0 : i32
    %c0_i32_1 = arith.constant 0 : i32
    return %arg0, %c0_i32, %c0_i32_0 : i32, i32, i32
  }
  func.func @transform_8(%arg0: i32) -> (i32, i32) {
    %c0_i32 = arith.constant 0 : i32
    %c0_i32_0 = arith.constant 0 : i32
    %c0_i32_1 = arith.constant 0 : i32
    return %c0_i32, %c0_i32_0 : i32, i32
  }
}

</mosaic_0001>

<bundles_post_ra>
// kernel: tpu_custom_call.1
= control target key start
LH: loop header
LB: loop body
LE: loop exit
PB: predicated region body
PF: predicated region fallthrough
CT: control target
= control target key end

     0   :  { %s1671_s0 = inlined_call_operand.hbm [shape: f32[8,8,128], index: 0, kind: input, shape index: {}]   ;;  %s1672_s1 = inlined_call_operand.hbm [shape: f32[8,128], index: 1, kind: input, shape index: {}]   ;;  %s1673_s2 = inlined_call_operand.hbm [shape: f32[128,128], index: 2, kind: input, shape index: {}]   ;;  %s1674_s3 = inlined_call_operand.hbm [shape: f32[128,128], index: 3, kind: input, shape index: {}]   ;;  %s1675_s4 = inlined_call_operand.vmem [shape: f32[1,128], index: 4, kind: input, shape index: {}]   ;;  %s1676_s5 = inlined_call_operand.hbm [shape: f32[128,128], index: 5, kind: input, shape index: {}]   ;;  %s1677_s6 = inlined_call_operand.vmem [shape: f32[1,128], index: 6, kind: input, shape index: {}]   ;;  %s1678_s7 = inlined_call_operand.hbm [shape: f32[8,8,128], index: 7, kind: output, shape index: {0}]   ;;  %s1679_s8 = inlined_call_operand.hbm [shape: f32[8,128], index: 8, kind: output, shape index: {1}]  }
   0x1   :  { %1685 = sst [smem:[#allocation20_spill]] %s1672_s1 }
   0x2   :  { %1686 = sst [smem:[#allocation21_spill]] %s1673_s2 }
   0x3   :  { %1687 = sst [smem:[#allocation22_spill]] %s1674_s3 }
   0x4   :  { %14 = vsyncpa [#allocation4], 0 }
   0x5   :  { %16 = vsyncpa [#allocation4 + $0x1], 0 }
   0x6   :  { %17 = vsyncpa [#allocation7], 0 }
   0x7   :  { %18 = vsyncpa [#allocation10], 0 }
   0x8   :  { %19 = vsyncpa [#allocation5], 0 }
   0x9   :  { %21 = vsyncpa [#allocation5 + $0x1], 0 }
   0xa   :  { %22 = vsyncpa [#allocation14], 0  ;;  %s1390_s27 = smov 0   ;;  %s1392_s28 = smov 0  }
   0xb   :  { %s1394_s29 = smov 0   ;;  %s1396_s30 = smov 0  }
   0xc LB: > { %s1334_s9 = smov [#allocation6]   ;;  %s1411_s11 = sadd.s32 4294967295, %s1332_s30   ;;  %s1332_s30 = sphi %s1396_s30, %s1714_s30   ;;  %s1328_s29 = sphi %s1394_s29, %s1713_s29   ;;  %s1324_s28 = sphi %s1392_s28, %s1712_s28   ;;  %s1320_s27 = sphi %s1390_s27, %s1711_s27  }
   0xd   : > { %s245_s10 = sshll.u32 %s1334_s9, 4  ;;  %p816_p0 = scmp.ge.s32.totalorder %s1332_s30, 1  ;;  %s246_s10 = int_to_ptr.vmem [resolvable:$true] %s245_s10 }
   0xe   : > { %p1681_p1 = scmp.eq.s32.totalorder %s1411_s11, 0  ;;  %p232_p2 = scmp.lt.s32.totalorder %s1332_s30, 9 }
   0xf   : > { %s1335_s13 = smov [#allocation9]   ;;  %s1336_s16 = smov [#allocation8]  }
  0x10   : > { %p1417_p4 = pnand %p816_p0, %p232_p2  ;;  %s268_s14 = sshll.u32 %s1335_s13, 4  ;;  %s1429_s14 = int_to_ptr.vmem [resolvable:$true] %s268_s14 }
  0x11   : > { %s255_s17 = sshll.u32 %s1336_s16, 4  ;;  %s1111_s18 = scalar_lea.vmem %s246_s10, 128  ;;  %s1431_s17 = int_to_ptr.vmem [resolvable:$true] %s255_s17 }
  0x12   : > { %s1688_s12 = scalar_select %p1417_p4, 1, 0 }
  0x13   : > { %p1020_p5 = pneg %p1417_p4  ;;  %p1112_p8 = scmp.ne.s32.totalorder %s246_s10, %s1111_s18 }
  0x14   : > { %p1119_p11 = scmp.lt.s32.totalorder %s246_s10, %s246_s10  ;;  %p1120_p12 = scmp.lt.s32.totalorder %s1111_s18, %s1111_s18 }
  0x15   : > { %p1425_p6 = pnand %p1020_p5, %p1681_p1 }
  0x16   : > { %p1121_p13 = por %p1120_p12, %p1119_p11 }
  0x17   : > { %p1102_p7 = pneg %p1425_p6 }
  0x19   : > { %p1114_p9 = pnand %p1112_p8, %p1102_p7 }
  0x1b   : > { %p1115_p10 = pneg %p1114_p9 }
  0x1d   : > { %p1122_p0 = pnand %p1121_p13, %p1115_p10 }
  0x1f   : > { %1125 = shalt.err (!%p1122_p0)
}
  0x20   : > { %s1690_s1 = sld [smem:[#allocation20_spill]]  ;;  %s1137_s21 = scalar_lea.vmem %s1429_s14, 2048 }
  0x21   : > { %p1138_p2 = scmp.ne.s32.totalorder %s1429_s14, %s1137_s21  ;;  %p1145_p9 = scmp.lt.s32.totalorder %s1429_s14, %s1429_s14 }
  0x22   : > { %p1146_p10 = scmp.lt.s32.totalorder %s1137_s21, %s1137_s21 }
  0x23   : > { %p1140_p5 = pnand %p1138_p2, %p1102_p7 }
  0x24   : > { %p1147_p11 = por %p1146_p10, %p1145_p9 }
  0x25   : > { %p1141_p8 = pneg %p1140_p5 }
  0x26   : > { %1023 = dma.hbm_to_vmem [thread:$0]  (!%p1425_p6), %s1690_s1, 128, %s246_s10, [#allocation7]  }
  0x27   : > { %p1148_p12 = pnand %p1147_p11, %p1141_p8 }
  0x29   : > { %1151 = shalt.err (!%p1148_p12)
}
  0x2a   : > { %s1337_s22 = smov 128   ;;  %s1338_s23 = smov 8  }
  0x2b   : > { %s1691_s3 = sld [smem:[#allocation22_spill]]  ;;  %s1163_s26 = scalar_lea.vmem %s1431_s17, 2048 }
  0x2c   : > { %p1164_p13 = scmp.ne.s32.totalorder %s1431_s17, %s1163_s26  ;;  %p1171_p5 = scmp.lt.s32.totalorder %s1431_s17, %s1431_s17 }
  0x2d   : > { %p1172_p8 = scmp.lt.s32.totalorder %s1163_s26, %s1163_s26 }
  0x2e   : > { %p1166_p0 = pnand %p1164_p13, %p1102_p7 }
  0x2f   : > { %p1173_p9 = por %p1172_p8, %p1171_p5 }
  0x30   : > { %p1167_p2 = pneg %p1166_p0 }
  0x31   : > { %1029 = dma.hbm_to_vmem [thread:$0]  (!%p1425_p6), %s1691_s3, 2048, %s1429_s14, [#allocation10], %s1337_s22, %s1337_s22, %s1338_s23  }
  0x32   : > { %p1174_p10 = pnand %p1173_p9, %p1167_p2 }
  0x34   : > { %1177 = shalt.err (!%p1174_p10)
}
  0x35   : > { %s1692_s2 = sld [smem:[#allocation21_spill]]  ;;  %s1339_s13 = smov [#allocation11]  }
  0x36   : > { %s284_s14 = sshll.u32 %s1339_s13, 4  ;;  %s285_s14 = int_to_ptr.vmem [resolvable:$true] %s284_s14 }
  0x37   : > { %s1189_s16 = scalar_lea.vmem %s285_s14, 2048  ;;  %p1197_p0 = scmp.lt.s32.totalorder %s285_s14, %s285_s14 }
  0x38   : > { %p1190_p11 = scmp.ne.s32.totalorder %s285_s14, %s1189_s16  ;;  %p1198_p2 = scmp.lt.s32.totalorder %s1189_s16, %s1189_s16 }
  0x3a   : > { %p1192_p12 = pnand %p1190_p11, %p1102_p7  ;;  %p1199_p5 = por %p1198_p2, %p1197_p0 }
  0x3b   : > { %1026 = dma.hbm_to_vmem [thread:$0]  (!%p1425_p6), %s1692_s2, 2048, %s1431_s17, [#allocation7], %s1337_s22, %s1337_s22, %s1338_s23  }
  0x3c   : > { %p1193_p13 = pneg %p1192_p12 }
  0x3e   : > { %p1200_p8 = pnand %p1199_p5, %p1193_p13 }
  0x40   : > { %1203 = shalt.err (!%p1200_p8)
}
  0x41   : > { %1032 = dma.hbm_to_vmem [thread:$0]  (!%p1425_p6), %s1676_s5, 2048, %s285_s14, [#allocation10], %s1337_s22, %s1337_s22, %s1338_s23  }
  0x42   : > { %s815_s15 = sadd.s32 4294967294, %s1332_s30   ;;  %s1479_s17 = sadd.s32 1, %s1332_s30  }
  0x43   : > { %s32_s20 = ssub.s32 %s1332_s30, %s1479_s17  ;;  %s35_s21 = sadd.s32 1, %s1328_s29 }
  0x44   : > { %p33_p7 = scmp.eq.s32.totalorder %s32_s20, 0  ;;  %p42_p9 = scmp.ne.s32.totalorder %s1328_s29, %s1324_s28 }
  0x45   : > { %p43_p10 = scmp.eq.s32.totalorder %s1332_s30, 0  ;;  %p48_p11 = scmp.ne.s32.totalorder %s1324_s28, %s1320_s27 }
  0x46   : > { %s1490_s24 = scalar_select %p33_p7, %s1328_s29, %s35_s21  }
  0x47   : > { %p1492_p12 = por %p43_p10, %p42_p9  ;;  %p1498_p6 = por %p1681_p1, %p48_p11 }
  0x48   : > { %p1680_p13 = scmp.eq.s32.totalorder %s1411_s11, 7  ;;  %p204_p0 = scmp.eq.s32.totalorder %s815_s15, 7 }
  0x49   : > { %s1694_s22 = scalar_select %p1498_p6, 1, 0 }
  0x4a   : > { %p1045_p2 = scmp.lt.s32.totalorder %s1332_s30, 8  ;;  %s301_s23 = sand.u32 1, %s1328_s29  }
  0x4b   : > { %p1507_p5 = por %p1680_p13, %p42_p9  ;;  %p1511_p8 = por %p204_p0, %p48_p11 }
  0x4c   : > { %s822_s10 = sshll.u32 %s301_s23, 3  ;;  %s823_s13 = sshll.u32 %s1332_s30, 7 }
  0x4d   : > { %s1695_s26 = scalar_select %p1507_p5, 1, 0 }
  0x4e   : > { %s1696_s9 = scalar_select %p1511_p8, 1, 0 }
  0x4f   : > { %s1519_s18 = scalar_lea.hbm %s1671_s0, %s823_s13  ;;  %s305_s19 = scalar_lea.vmem [#allocation3], %s822_s10 }
  0x50   : > { %s312_s15 = sshll.u32 %s305_s19, 4  ;;  %p1523_p7 = pnand %p1045_p2, %p1492_p12  ;;  %s313_s15 = int_to_ptr.vmem [resolvable:$true] %s312_s15 }
  0x51   : > { %s302_s21 = scalar_lea.sflag [#allocation4], %s301_s23  ;;  %s1204_s1 = scalar_lea.hbm %s1519_s18, 128 }
  0x52   : > { %p1205_p9 = scmp.ne.s32.totalorder %s1519_s18, %s1204_s1  ;;  %p1206_p10 = pneg %p1523_p7 }
  0x53   : > { %s1209_s16 = scalar_lea.hbm %s1671_s0, 1024  ;;  %p1210_p13 = scmp.lt.s32.totalorder %s1519_s18, %s1671_s0 }
  0x54   : > { %p1207_p11 = pnand %p1206_p10, %p1205_p9  ;;  %p1211_p12 = scmp.lt.s32.totalorder %s1209_s16, %s1204_s1 }
  0x56   : > { %p1208_p0 = pneg %p1207_p11  ;;  %p1212_p2 = por %p1211_p12, %p1210_p13 }
  0x58   : > { %p1213_p3 = pnand %p1212_p2, %p1208_p0 }
  0x5a   : > { %1216 = shalt.err (!%p1213_p3)
}
  0x5b   : > { %s1217_s25 = scalar_lea.vmem %s313_s15, 128  ;;  %s1340_s23 = smov [#allocation3]  }
  0x5c   : > { %p1218_p1 = scmp.ne.s32.totalorder %s313_s15, %s1217_s25  ;;  %s1222_s2 = sshll.u32 %s1340_s23, 4  ;;  %s1223_s2 = int_to_ptr.vmem [resolvable:$false] %s1222_s2 }
  0x5d   : > { %s1224_s3 = scalar_lea.vmem %s1223_s2, 256  ;;  %p1225_p9 = scmp.lt.s32.totalorder %s313_s15, %s1223_s2 }
  0x5e   : > { %p1220_p8 = pnand %p1218_p1, %p1206_p10  ;;  %p1226_p11 = scmp.lt.s32.totalorder %s1224_s3, %s1217_s25 }
  0x60   : > { %p1221_p5 = pneg %p1220_p8  ;;  %p1227_p6 = por %p1226_p11, %p1225_p9 }
  0x62   : > { %p1228_p4 = pnand %p1227_p6, %p1221_p5 }
  0x64   : > { %1231 = shalt.err (!%p1228_p4)
}
  0x65   : > { %1036 = dma.hbm_to_vmem [thread:$0]  (!%p1523_p7), %s1519_s18, 128, %s313_s15, %s302_s21  }
  0x66   : > { %p1698_p13 = scmp.ne.s32.totalorder %s1688_s12, 0 }
  0x67   : > { %s1544_s1 = sand.u32 (!%p1698_p13), 1, %s1324_s28   ;;  %p1699_p1 = scmp.ne.s32.totalorder (!%p1698_p13), %s1694_s22, 0 }
  0x68   : > { %321 = sbr.rel (%p1698_p13) target bundleno = 895 (0x37f), region = 48  ;;  %s825_s13 = sshll.u32 (!%p1698_p13), %s1544_s1, 3 }
  0x69   : > { %s324_s14 = scalar_lea.sflag (!%p1698_p13), [#allocation4], %s1544_s1  ;;  %s1548_s2 = scalar_lea.vmem (!%p1698_p13), [#allocation3], %s825_s13 }
  0x6d   : > { %1299 = dma.done.wait (%p1699_p1), %s324_s14, 128  }
  0x6e   : > { %1301 = vsyncadd (%p1699_p1), %s324_s14, 4294967168  ;;  %p1700_p3 = scmp.eq.s32.totalorder %s1411_s11, 0 }
  0x70   : > { %1303 = dma.done.wait (%p1700_p3), [#allocation7], 2176   ;;  %p1701_p4 = pmov %p1700_p3 }
  0x71   : > { %p1702_p6 = pmov %p1700_p3 }
  0x72   : > { %1305 = vsyncadd (%p1701_p4), [#allocation7], 4294965120 }
  0x73   : > { %1307 = dma.done.wait (%p1702_p6), [#allocation10], 4096   ;;  %p1703_p5 = pmov %p1700_p3 }
  0x74   : > { %s1562_s3 = scalar_lea.vmem [#allocation12], %s825_s13  ;;  %p1704_p8 = scmp.ne.s32.totalorder %s1411_s11, 0 }
  0x75   : > { %1309 = vsyncadd (%p1703_p5), [#allocation10], 4294963200 }
  0x76   : > { %379 = sbr.rel (%p1704_p8) target bundleno = 125 (0x7d), region = 72 }
  0x7b   : > { %v380_v0 = vld [vmem:[#allocation6] sm:$0xff] }
  0x7c   : > { %381 = vst [vmem:[#allocation2] sm:$0xff] %v380_v0 }
  0x7d PF: > { %v415_v1 = vld [vmem:[#allocation9 + $0x78] sm:$0xff]  ;;  %v1341_v3 = vmov 0.0   ;;  %v414_v4 = vld [vmem:[#allocation9 + $0x70] sm:$0xff]  ;;  %v413_v6 = vld [vmem:[#allocation9 + $0x68] sm:$0xff]  ;;  %vm1342_vm0 = vmmov 0   ;;  %s1343_s20 = smov [#allocation13]  }
  0x7e   : > { %v399_v2 = vld [vmem:[#allocation8 + $0x78] sm:$0xff]  ;;  %891 = vmatprep.subr.mxu0 %v1341_v3  ;;  %926 = vmatprep.subr.mxu1 %v1341_v3  ;;  %v398_v5 = vld [vmem:[#allocation8 + $0x70] sm:$0xff]  ;;  %v397_v7 = vld [vmem:[#allocation8 + $0x68] sm:$0xff]  ;;  %s696_s21 = sshll.u32 %s1343_s20, 4  ;;  %p1705_p10 = scmp.eq.s32.totalorder %s1411_s11, 7  ;;  %s697_s21 = int_to_ptr.vmem [resolvable:$true] %s696_s21 }
  0x7f   : > { %892 = vmatpush3.msra.mxu0 %v415_v1  ;;  %927 = vmatpush3.msra.mxu1 %v399_v2  ;;  %v412_v8 = vld [vmem:[#allocation9 + $0x60] sm:$0xff]  ;;  %v411_v10 = vld [vmem:[#allocation9 + $0x58] sm:$0xff]  ;;  %v410_v12 = vld [vmem:[#allocation9 + $0x50] sm:$0xff]  ;;  %s1232_s16 = scalar_lea.vmem %s697_s21, 128  ;;  %p1239_p2 = scmp.lt.s32.totalorder %s697_s21, %s697_s21 }
  0x80   : > { %893 = vmatprep.subr.mxu0 %v1341_v3  ;;  %928 = vmatprep.subr.mxu1 %v1341_v3  ;;  %v396_v9 = vld [vmem:[#allocation8 + $0x60] sm:$0xff]  ;;  %v395_v11 = vld [vmem:[#allocation8 + $0x58] sm:$0xff]  ;;  %v394_v13 = vld [vmem:[#allocation8 + $0x50] sm:$0xff]  ;;  %p1233_p7 = scmp.ne.s32.totalorder %s697_s21, %s1232_s16  ;;  %p1240_p9 = scmp.lt.s32.totalorder %s1232_s16, %s1232_s16 }
  0x81   : > { %894 = vmatpush3.msra.mxu0 %v414_v4  ;;  %929 = vmatpush3.msra.mxu1 %v398_v5  ;;  %v409_v14 = vld [vmem:[#allocation9 + $0x48] sm:$0xff]  ;;  %v408_v16 = vld [vmem:[#allocation9 + $0x40] sm:$0xff]  ;;  %v407_v18 = vld [vmem:[#allocation9 + $0x38] sm:$0xff] }
  0x82   : > { %895 = vmatprep.subr.mxu0 %v1341_v3  ;;  %930 = vmatprep.subr.mxu1 %v1341_v3  ;;  %v393_v15 = vld [vmem:[#allocation8 + $0x48] sm:$0xff]  ;;  %v392_v17 = vld [vmem:[#allocation8 + $0x40] sm:$0xff]  ;;  %v391_v19 = vld [vmem:[#allocation8 + $0x38] sm:$0xff]  ;;  %p1234_p0 = pnand %p1233_p7, %p1705_p10  ;;  %p1241_p11 = por %p1240_p9, %p1239_p2 }
  0x83   : > { %896 = vmatpush3.msra.mxu0 %v413_v6  ;;  %931 = vmatpush3.msra.mxu1 %v397_v7  ;;  %v406_v20 = vld [vmem:[#allocation9 + $0x30] sm:$0xff]  ;;  %v405_v22 = vld [vmem:[#allocation9 + $0x28] sm:$0xff]  ;;  %v404_v24 = vld [vmem:[#allocation9 + $0x20] sm:$0xff] }
  0x84   : > { %897 = vmatprep.subr.mxu0 %v1341_v3  ;;  %932 = vmatprep.subr.mxu1 %v1341_v3  ;;  %v390_v21 = vld [vmem:[#allocation8 + $0x30] sm:$0xff]  ;;  %v389_v23 = vld [vmem:[#allocation8 + $0x28] sm:$0xff]  ;;  %v388_v25 = vld [vmem:[#allocation8 + $0x20] sm:$0xff]  ;;  %p1235_p12 = pneg %p1234_p0 }
  0x85   : > { %898 = vmatpush3.msra.mxu0 %v412_v8  ;;  %933 = vmatpush3.msra.mxu1 %v396_v9  ;;  %v403_v26 = vld [vmem:[#allocation9 + $0x18] sm:$0xff]  ;;  %v402_v28 = vld [vmem:[#allocation9 + $0x10] sm:$0xff]  ;;  %v401_v30 = vld [vmem:[#allocation9 + $0x8] sm:$0xff] }
  0x86   : > { %899 = vmatprep.subr.mxu0 %v1341_v3  ;;  %934 = vmatprep.subr.mxu1 %v1341_v3  ;;  %v387_v27 = vld [vmem:[#allocation8 + $0x18] sm:$0xff]  ;;  %v386_v29 = vld [vmem:[#allocation8 + $0x10] sm:$0xff]  ;;  %v385_v31 = vld [vmem:[#allocation8 + $0x8] sm:$0xff]  ;;  %p1242_p13 = pnand %p1241_p11, %p1235_p12 }
  0x87   : > { %900 = vmatpush3.msra.mxu0 %v411_v10  ;;  %935 = vmatpush3.msra.mxu1 %v395_v11  ;;  %v400_v32 = vld [vmem:[#allocation9] sm:$0xff]  ;;  %v382_v35 = vld [vmem:[%s1548_s2] sm:$0xff]  ;;  %v582_v36 = vld [vmem:[#allocation11 + $0x78] sm:$0xff] }
  0x88   : > { %901 = vmatprep.subr.mxu0 %v1341_v3  ;;  %936 = vmatprep.subr.mxu1 %v1341_v3  ;;  %v384_v33 = vld [vmem:[#allocation8] sm:$0xff]  ;;  %v581_v37 = vld [vmem:[#allocation11 + $0x70] sm:$0xff]  ;;  %v580_v38 = vld [vmem:[#allocation11 + $0x68] sm:$0xff] }
  0x89   : > { %902 = vmatpush3.msra.mxu0 %v410_v12  ;;  %937 = vmatpush3.msra.mxu1 %v394_v13  ;;  %v383_v34 = vld [vmem:[#allocation2] sm:$0xff]  ;;  %v578_v40 = vld [vmem:[#allocation11 + $0x58] sm:$0xff]  ;;  %v577_v41 = vld [vmem:[#allocation11 + $0x50] sm:$0xff] }
  0x8a   : > { %903 = vmatprep.subr.mxu0 %v1341_v3  ;;  %938 = vmatprep.subr.mxu1 %v1341_v3  ;;  %v579_v39 = vld [vmem:[#allocation11 + $0x60] sm:$0xff]  ;;  %v576_v42 = vld [vmem:[#allocation11 + $0x48] sm:$0xff]  ;;  %v574_v44 = vld [vmem:[#allocation11 + $0x38] sm:$0xff] }
  0x8b   : > { %904 = vmatpush3.msra.mxu0 %v409_v14  ;;  %939 = vmatpush3.msra.mxu1 %v393_v15  ;;  %v575_v43 = vld [vmem:[#allocation11 + $0x40] sm:$0xff]  ;;  %v573_v45 = vld [vmem:[#allocation11 + $0x30] sm:$0xff]  ;;  %v572_v46 = vld [vmem:[#allocation11 + $0x28] sm:$0xff] }
  0x8c   : > { %905 = vmatprep.subr.mxu0 %v1341_v3  ;;  %940 = vmatprep.subr.mxu1 %v1341_v3  ;;  %v571_v47 = vld [vmem:[#allocation11 + $0x20] sm:$0xff]  ;;  %v570_v48 = vld [vmem:[#allocation11 + $0x18] sm:$0xff]  ;;  %v569_v49 = vld [vmem:[#allocation11 + $0x10] sm:$0xff] }
  0x8d   : > { %906 = vmatpush3.msra.mxu0 %v408_v16  ;;  %941 = vmatpush3.msra.mxu1 %v392_v17  ;;  %v568_v50 = vld [vmem:[#allocation11 + $0x8] sm:$0xff]  ;;  %v567_v51 = vld [vmem:[#allocation11] sm:$0xff] }
  0x8e   : > { %907 = vmatprep.subr.mxu0 %v1341_v3  ;;  %942 = vmatprep.subr.mxu1 %v1341_v3  ;;  %v832_v54 = vld [vmem:[%s1675_s4] ss:$0 sm:$0xff] }
  0x8f   : > { %908 = vmatpush3.msra.mxu0 %v407_v18  ;;  %943 = vmatpush3.msra.mxu1 %v391_v19  ;;  %v833_v60 = vld [vmem:[%s1677_s6] ss:$0 sm:$0xff] }
  0x90   : > { %909 = vmatprep.subr.mxu0 %v1341_v3  ;;  %944 = vmatprep.subr.mxu1 %v1341_v3 }
  0x91   : > { %910 = vmatpush3.msra.mxu0 %v406_v20  ;;  %945 = vmatpush3.msra.mxu1 %v390_v21 }
  0x92   : > { %911 = vmatprep.subr.mxu0 %v1341_v3  ;;  %946 = vmatprep.subr.mxu1 %v1341_v3 }
  0x93   : > { %912 = vmatpush3.msra.mxu0 %v405_v22  ;;  %947 = vmatpush3.msra.mxu1 %v389_v23 }
  0x94   : > { %913 = vmatprep.subr.mxu0 %v1341_v3  ;;  %948 = vmatprep.subr.mxu1 %v1341_v3 }
  0x95   : > { %914 = vmatpush3.msra.mxu0 %v404_v24  ;;  %949 = vmatpush3.msra.mxu1 %v388_v25 }
  0x96   : > { %915 = vmatprep.subr.mxu0 %v1341_v3  ;;  %950 = vmatprep.subr.mxu1 %v1341_v3 }
  0x97   : > { %916 = vmatpush3.msra.mxu0 %v403_v26  ;;  %951 = vmatpush3.msra.mxu1 %v387_v27 }
  0x98   : > { %917 = vmatprep.subr.mxu0 %v1341_v3  ;;  %952 = vmatprep.subr.mxu1 %v1341_v3 }
  0x99   : > { %918 = vmatpush3.msra.mxu0 %v402_v28  ;;  %953 = vmatpush3.msra.mxu1 %v386_v29 }
  0x9a   : > { %919 = vmatprep.subr.mxu0 %v1341_v3  ;;  %954 = vmatprep.subr.mxu1 %v1341_v3 }
  0x9b   : > { %920 = vmatpush3.msra.mxu0 %v401_v30  ;;  %955 = vmatpush3.msra.mxu1 %v385_v31 }
  0x9c   : > { %921 = vmatprep.subr.mxu0 %v1341_v3  ;;  %956 = vmatprep.subr.mxu1 %v1341_v3 }
  0x9d   : > { %922 = vmatpush3.msra.mxu0 %v400_v32  ;;  %923 = vmatprep.mubr.msk.f32.mxu0 %vm1342_vm0, %v1341_v3 }
  0x9e   : > { %957 = vmatpush3.msra.mxu1 %v384_v33  ;;  %958 = vmatprep.mubr.msk.f32.mxu1 %vm1342_vm0, %v1341_v3 }
  0x9f   : > { %924 = vmatmul.mubr.f32.vlgmr.msra.gmra.mxu0 %v383_v34  ;;  %959 = vmatmul.mubr.f32.vlgmr.msra.gmra.mxu1 %v382_v35 }
  0xa0   : > { %961 = vmatprep.subr.mxu0 %v1341_v3  ;;  %993 = vmatprep.mubr.msk.f32.mxu0 %vm1342_vm0, %v1341_v3 }
  0xa1   : > { %962 = vmatpush3.msra.mxu0 %v582_v36 }
  0xa2   : > { %963 = vmatprep.subr.mxu0 %v1341_v3 }
  0xa3   : > { %964 = vmatpush3.msra.mxu0 %v581_v37 }
  0xa4   : > { %965 = vmatprep.subr.mxu0 %v1341_v3 }
  0xa5   : > { %966 = vmatpush3.msra.mxu0 %v580_v38 }
  0xa6   : > { %967 = vmatprep.subr.mxu0 %v1341_v3 }
  0xa7   : > { %968 = vmatpush3.msra.mxu0 %v579_v39 }
  0xa8   : > { %969 = vmatprep.subr.mxu0 %v1341_v3 }
  0xa9   : > { %970 = vmatpush3.msra.mxu0 %v578_v40 }
  0xaa   : > { %971 = vmatprep.subr.mxu0 %v1341_v3 }
  0xab   : > { %972 = vmatpush3.msra.mxu0 %v577_v41 }
  0xac   : > { %973 = vmatprep.subr.mxu0 %v1341_v3 }
  0xad   : > { %974 = vmatpush3.msra.mxu0 %v576_v42 }
  0xae   : > { %975 = vmatprep.subr.mxu0 %v1341_v3 }
  0xaf   : > { %976 = vmatpush3.msra.mxu0 %v575_v43 }
  0xb0   : > { %977 = vmatprep.subr.mxu0 %v1341_v3 }
  0xb1   : > { %978 = vmatpush3.msra.mxu0 %v574_v44 }
  0xb2   : > { %979 = vmatprep.subr.mxu0 %v1341_v3 }
  0xb3   : > { %980 = vmatpush3.msra.mxu0 %v573_v45 }
  0xb4   : > { %981 = vmatprep.subr.mxu0 %v1341_v3 }
  0xb5   : > { %982 = vmatpush3.msra.mxu0 %v572_v46 }
  0xb6   : > { %983 = vmatprep.subr.mxu0 %v1341_v3 }
  0xb7   : > { %984 = vmatpush3.msra.mxu0 %v571_v47 }
  0xb8   : > { %985 = vmatprep.subr.mxu0 %v1341_v3 }
  0xb9   : > { %986 = vmatpush3.msra.mxu0 %v570_v48 }
  0xba   : > { %987 = vmatprep.subr.mxu0 %v1341_v3 }
  0xbb   : > { %988 = vmatpush3.msra.mxu0 %v569_v49 }
  0xbc   : > { %989 = vmatprep.subr.mxu0 %v1341_v3 }
  0xbd   : > { %990 = vmatpush3.msra.mxu0 %v568_v50 }
  0xbe   : > { %991 = vmatprep.subr.mxu0 %v1341_v3 }
  0xbf   : > { %992 = vmatpush3.msra.mxu0 %v567_v51 }
 0x15f   : > { %v482_v52 = vpop.f32.mrf.mxu0  ;;  %v552_v53 = vpop.f32.mrf.mxu1 }
 0x160   : > { %v553_v55 = vadd.f32 %v552_v53, %v482_v52 }
 0x161   : > { %v925_v56 = vpop.f32.mrf.mxu0  ;;  %v960_v57 = vpop.f32.mrf.mxu1 }
 0x162   : > { %v563_v58 = vadd.f32 %v832_v54, %v553_v55 }
 0x164   : > { %1094 = vtanh.f32 %v563_v58 }
 0x171   : > { %v1095_v59 = vpop.eup %1094 }
 0x172   : > { %565 = vst [vmem:[#allocation2] sm:$0xff] %v1095_v59  ;;  %566 = vst [vmem:[#allocation13] sm:$0xff] %v1095_v59  ;;  %994 = vmatmul.mubr.f32.vlgmr.msra.gmra.mxu0 %v1095_v59 }
 0x232   : > { %v656_v61 = vpop.f32.mrf.mxu0 }
 0x233   : > { %v657_v62 = vadd.f32 %v833_v60, %v656_v61 }
 0x234   : > { %v995_v63 = vpop.f32.mrf.mxu0 }
 0x235   : > { %660 = vmax.xlane.f32.xlu0 %v657_v62 }
 0x2be   : > { %v661_v0 = vpop.xlane.xlu0 %660 }
 0x2bf   : > { %v662_v1 = vsub.f32 %v657_v62, %v661_v0 }
 0x2c1   : > { %v663_v2 = vmul.f32 1.442695, %v662_v1 }
 0x2c3   : > { %1096 = vpow2.f32 %v663_v2 }
 0x2d0   : > { %v1097_v3 = vpop.eup %1096 }
 0x2d1   : > { %665 = vadd.xlane.f32.xlu0 %v1097_v3 }
 0x2d2   : > { %1245 = shalt.err (!%p1242_p13)
}
 0x2d3   : > { %p1706_p1 = pmov %p1705_p10  ;;  %s835_s25 = sshll.u32 %s1411_s11, 7 }
 0x2d4   : > { %s685_s23 = sshll.u32 %s1562_s3, 4  ;;  %s683_s2 = scalar_lea.hbm %s1678_s7, %s835_s25  ;;  %s686_s23 = int_to_ptr.vmem [resolvable:$true] %s685_s23 }
 0x2d5   : > { %1016 = dma.vmem_to_hbm [thread:$0]  (%p1706_p1), %s697_s21, 128, %s1679_s8, [#allocation14]  }
 0x2d6   : > { %s672_s12 = scalar_lea.sflag [#allocation5], %s1544_s1  ;;  %s1256_s22 = scalar_lea.vmem %s686_s23, 128 }
 0x2d7   : > { %p1257_p3 = scmp.ne.s32.totalorder %s686_s23, %s1256_s22  ;;  %p1707_p4 = scmp.ne.s32.totalorder %s1695_s26, 0 }
 0x2d8   : > { %s1344_s18 = smov [#allocation12]  }
 0x2d9   : > { %p1258_p6 = pnand %p1257_p3, %p1707_p4  ;;  %s1260_s15 = sshll.u32 %s1344_s18, 4  ;;  %s1261_s15 = int_to_ptr.vmem [resolvable:$false] %s1260_s15 }
 0x2da   : > { %s1262_s20 = scalar_lea.vmem %s1261_s15, 256  ;;  %p1263_p8 = scmp.lt.s32.totalorder %s686_s23, %s1261_s15 }
 0x2db   : > { %p1259_p5 = pneg %p1258_p6  ;;  %p1264_p7 = scmp.lt.s32.totalorder %s1262_s20, %s1256_s22 }
 0x2dd   : > { %p1265_p10 = por %p1264_p7, %p1263_p8 }
 0x2df   : > { %p1266_p0 = pnand %p1265_p10, %p1259_p5 }
 0x35a   : > { %v666_v4 = vpop.xlane.xlu0 %665 }
 0x35b   : > { %1098 = vlog2.f32 %v666_v4 }
 0x368   : > { %v1099_v5 = vpop.eup %1098 }
 0x369   : > { %v668_v6 = vmul.f32 0.6931472, %v1099_v5 }
 0x36b   : > { %v669_v7 = vsub.f32 %v662_v1, %v668_v6 }
 0x36d   : > { %670 = vst [vmem:[%s1562_s3] sm:$0xff] %v669_v7 }
 0x36e   : > { %1269 = shalt.err (!%p1266_p0)
}
 0x36f   : > { %s1270_s21 = scalar_lea.hbm %s683_s2, 128  ;;  %s1274_s16 = scalar_lea.hbm %s1678_s7, 1024 }
 0x370   : > { %p1271_p12 = scmp.ne.s32.totalorder %s683_s2, %s1270_s21  ;;  %p1275_p11 = scmp.lt.s32.totalorder %s683_s2, %s1678_s7 }
 0x371   : > { %p1276_p13 = scmp.lt.s32.totalorder %s1274_s16, %s1270_s21 }
 0x372   : > { %p1272_p2 = pnand %p1271_p12, %p1707_p4 }
 0x373   : > { %p1277_p1 = por %p1276_p13, %p1275_p11 }
 0x374   : > { %p1273_p9 = pneg %p1272_p2 }
 0x376   : > { %p1278_p3 = pnand %p1277_p1, %p1273_p9 }
 0x378   : > { %1281 = shalt.err (!%p1278_p3)
}
 0x379   : > { %1014 = dma.vmem_to_hbm [thread:$0]  (%p1707_p4), %s686_s23, 128, %s683_s2, %s672_s12  }
 0x37a   : > { %p1708_p6 = scmp.eq.s32.totalorder %s1411_s11, 7 }
 0x37c   : > { %1311 = dma.done.wait (%p1708_p6), [#allocation14], 128   ;;  %p1709_p5 = pmov %p1708_p6 }
 0x37e   : > { %1313 = vsyncadd (%p1709_p5), [#allocation14], 4294967168 }
 0x37f PF: > { %p1052_p8 = scmp.ge.s32.totalorder %s1332_s30, 2  ;;  %s712_s25 = sand.u32 1, %s1320_s27  }
 0x380   : > { %p1710_p7 = scmp.ne.s32.totalorder %s1696_s9, 0  ;;  %s713_s13 = scalar_lea.sflag [#allocation5], %s712_s25 }
 0x382   : > { %p1038_p10 = pnand %p1052_p8, %p1710_p7 }
 0x384   : > { %p1039_p0 = pneg %p1038_p10 }
 0x386   : > { %1315 = dma.done.wait (%p1039_p0), %s713_s13, 128  }
 0x387   : > { %1317 = vsyncadd (%p1039_p0), %s713_s13, 4294967168  ;;  %p25_p4 = scmp.ge.s32.totalorder %s1479_s17, 10   ;;  %s1711_s27 = smov %s1324_s28 }
 0x388   : > { %s1712_s28 = smov %s1328_s29  ;;  %s1713_s29 = smov %s1490_s24 }
 0x389   : > { %s1714_s30 = smov %s1479_s17  ;;  %27 = sbr.rel (!%p25_p4) target bundleno = 12 (0xc), region = 121 }
 0x38e   :  { %718 = vsyncpa [#allocation4], 1 }
 0x38f   :  { %720 = vsyncpa [#allocation4 + $0x1], 1 }
 0x390   :  { %721 = vsyncpa [#allocation7], 1 }
 0x391   :  { %722 = vsyncpa [#allocation10], 1 }
 0x392   :  { %723 = vsyncpa [#allocation5], 1 }
 0x393   :  { %725 = vsyncpa [#allocation5 + $0x1], 1 }
 0x394   :  { %726 = vsyncpa [#allocation14], 1 }

</bundles_post_ra>
